<compile_context>
chip_gen: v7x
topology: tpu7x:2x2x1
jax: 0.10.0
libtpu: 0.0.40
codegen_flags: <defaults>
</compile_context>

<pallas_src>
import functools

import jax
import jax.numpy as jnp
from jax import lax
from jax.experimental import pallas as pl
from jax.experimental.pallas import tpu as pltpu


def _round_up(x, mult):
    return ((x + mult - 1) // mult) * mult


def _mlp_kernel(x_ref, w0_ref, b0_ref, w1_ref, b1_ref, w2_ref, b2_ref, ot_ref):
    """One row tile per grid step; weights/biases fully VMEM-resident.

    x_ref : [tile_m, input_size]   natural layout (contiguous HBM rows)
    w*    : [out_feat, in_feat]    PyTorch layout, dtype == x storage dtype
    b*    : [out_feat, 1]          float32 (lane-broadcast over tile_m)
    ot_ref: [output_size, tile_m]  feature-major, lane-dense store
    """
    cdt = x_ref.dtype  # dot-operand (storage) dtype; accumulation is always f32

    # Layer 0: contract over input_size with the transpose folded into the
    # dot_general dimension numbers -> lane-dense [hidden, tile_m] activations.
    h = lax.dot_general(
        w0_ref[...], x_ref[...],
        dimension_numbers=(((1,), (1,)), ((), ())),
        preferred_element_type=jnp.float32,
    )
    h = jnp.maximum(h + b0_ref[...], 0.0)          # f32 bias + ReLU, full vregs

    # Layer 1.
    h = jnp.dot(w1_ref[...], h.astype(cdt), preferred_element_type=jnp.float32)
    h = jnp.maximum(h + b1_ref[...], 0.0)

    # Layer 2 (no activation).
    o = jnp.dot(w2_ref[...], h.astype(cdt), preferred_element_type=jnp.float32)
    o = o + b2_ref[...]

    ot_ref[...] = o.astype(ot_ref.dtype)


def _choose_tile(m, tile_m):
    # Small inputs: one full-extent block (allowed even when m % 128 != 0).
    if m <= 256:
        return m
    # Medium inputs: keep >= 2 grid steps so the "parallel" axis can shard
    # across v7x's 2 TensorCores; large inputs cap at tile_m (last tile masked).
    half = (m + 1) // 2
    return int(min(tile_m, _round_up(half, 128)))


def _vmem_limit_bytes(tile, input_size, hidden_size, output_size, itemsize):
    lane = lambda n: _round_up(max(n, 1), 128)
    sub = lambda n: _round_up(max(n, 1), 8)
    # Double-buffered pipelined blocks (lane/sublane-padded VMEM layouts).
    x_blk = 2 * sub(tile) * lane(input_size) * itemsize
    o_blk = 2 * sub(output_size) * lane(tile) * itemsize
    # f32 intermediates: transposed x tile + two hidden activations + out tile.
    inter = (lane(input_size) + 2 * sub(hidden_size) + sub(output_size)) * lane(tile) * 4
    est = x_blk + o_blk + inter + (4 << 20)  # weights/biases + margin
    # Raise above the 16/32 MiB scoped defaults; stay within v7x's 64 MiB VMEM.
    return int(min(max(est, 32 << 20), 64 << 20))


def particle_predictor_forward(x, params, *, tile_m=8192):
    """x: [..., input_size] -> [..., output_size].

    params: (w0, b0, w1, b1, w2, b2) with w_i in PyTorch layout
    [out_features, in_features] and b_i of shape [out_features, 1].
    tile_m: row-tile size for large inputs (sweep 8192-32768 per generation;
    keep it lower on v7x, which has 64 MiB VMEM per TensorCore).
    """
    w0, b0, w1, b1, w2, b2 = params
    hidden_size, input_size = w0.shape
    output_size = w2.shape[0]

    s_x = x.shape
    x2d = x.reshape(-1, s_x[-1])                       # natural [m, input_size]
    m = x2d.shape[0]

    # Harmonize dtypes once here (not per grid step in the body):
    # weights share the x storage dtype (bf16 operands feed the MXU directly),
    # biases stay f32 for the VPU bias-add / ReLU path.
    dot_dtype = x2d.dtype
    w0, w1, w2 = (w.astype(dot_dtype) for w in (w0, w1, w2))
    b0, b1, b2 = (b.astype(jnp.float32) for b in (b0, b1, b2))

    tile = _choose_tile(m, tile_m)
    grid = (pl.cdiv(m, tile),)

    outt = pl.pallas_call(
        _mlp_kernel,
        out_shape=jax.ShapeDtypeStruct((output_size, m), x.dtype),
        grid_spec=pltpu.PrefetchScalarGridSpec(
            num_scalar_prefetch=0,
            grid=grid,
            in_specs=[
                pl.BlockSpec((tile, input_size), lambda i: (i, 0)),          # x rows
                pl.BlockSpec((hidden_size, input_size), lambda i: (0, 0)),   # w0
                pl.BlockSpec((hidden_size, 1), lambda i: (0, 0)),            # b0
                pl.BlockSpec((hidden_size, hidden_size), lambda i: (0, 0)),  # w1
                pl.BlockSpec((hidden_size, 1), lambda i: (0, 0)),            # b1
                pl.BlockSpec((output_size, hidden_size), lambda i: (0, 0)),  # w2
                pl.BlockSpec((output_size, 1), lambda i: (0, 0)),            # b2
            ],
            out_specs=pl.BlockSpec((output_size, tile), lambda i: (0, i)),
        ),
        compiler_params=pltpu.CompilerParams(
            # Independent row tiles -> shardable across v7x's two TensorCores.
            dimension_semantics=("parallel",),
            vmem_limit_bytes=_vmem_limit_bytes(
                tile, input_size, hidden_size, output_size,
                jnp.dtype(dot_dtype).itemsize),
        ),
    )(x2d, w0, b0, w1, b1, w2, b2)

    # Feature-major -> row-major.  Justified: output_size << 128, so a natural
    # [tile, output_size] out block would force 8/128-lane masked stores (16x
    # vst) and 16x VMEM inflation in-kernel; this single 2*output_size*m*4-byte
    # HBM pass is the cheaper side.  Consumers that accept [output_size, m]
    # can use `outt` directly and skip it.
    out2d = outt.T
    return out2d.reshape(tuple(s_x[:-1]) + (output_size,))


def init_params(key, input_size, hidden_size, output_size, dtype=jnp.float32):
    """Deterministic init matching nn.Linear's U(-1/sqrt(fan_in), 1/sqrt(fan_in)).

    Weights in PyTorch layout [out_features, in_features]; biases [out_features, 1].
    """
    keys = jax.random.split(key, 6)

    def linear(kw, kb, fan_in, fan_out):
        bound = 1.0 / (fan_in ** 0.5)
        w = jax.random.uniform(kw, (fan_out, fan_in), dtype, -bound, bound)
        b = jax.random.uniform(kb, (fan_out, 1), dtype, -bound, bound)
        return w, b

    w0, b0 = linear(keys[0], keys[1], input_size, hidden_size)
    w1, b1 = linear(keys[2], keys[3], hidden_size, hidden_size)
    w2, b2 = linear(keys[4], keys[5], hidden_size, output_size)
    return (w0, b0, w1, b1, w2, b2)


def _reference_forward(x, params):
    """Pure-JAX reference (f32 compute)."""
    w0, b0, w1, b1, w2, b2 = (p.astype(jnp.float32) for p in params)
    s_x = x.shape
    h = x.reshape(-1, s_x[-1]).astype(jnp.float32)
    h = jax.nn.relu(h @ w0.T + b0[:, 0])
    h = jax.nn.relu(h @ w1.T + b1[:, 0])
    h = h @ w2.T + b2[:, 0]
    return h.reshape(tuple(s_x[:-1]) + (w2.shape[0],))


if __name__ == "__main__":
    input_size, hidden_size, output_size = 16, 32, 8
    batch, seq = 2, 8  # leading dims; forward flattens all but the last axis

    key = jax.random.PRNGKey(0)
    k_x, k_p, k_x2, k_x3 = jax.random.split(key, 4)
    params = init_params(k_p, input_size, hidden_size, output_size)

    fwd = jax.jit(functools.partial(particle_predictor_forward, tile_m=8192))

    # Small shape: single full-extent block (m = 16).
    x = jax.random.normal(k_x, (batch, seq, input_size), dtype=jnp.float32)
    out = jax.block_until_ready(fwd(x, params))
    ref = _reference_forward(x, params)
    assert out.shape == (batch, seq, output_size)
    assert jnp.allclose(out, ref, atol=1e-5, rtol=1e-5)

    # Multi-step grid: m = 1024 -> two 512-row tiles.
    x_big = jax.random.normal(k_x2, (8, 128, input_size), dtype=jnp.float32)
    out_big = jax.block_until_ready(fwd(x_big, params))
    ref_big = _reference_forward(x_big, params)
    assert jnp.allclose(out_big, ref_big, atol=1e-4, rtol=1e-4)

    # Partial last tile: m = 300 (> 256, not a multiple of 128) -> 256-row tiles
    # with the trailing 44-row tile masked on the output store.
    x_odd = jax.random.normal(k_x3, (3, 100, input_size), dtype=jnp.float32)
    out_odd = jax.block_until_ready(fwd(x_odd, params))
    ref_odd = _reference_forward(x_odd, params)
    assert jnp.allclose(out_odd, ref_odd, atol=1e-4, rtol=1e-4)

    # bf16 storage path: bf16 operands feed the MXU directly (f32 accumulation);
    # bias-add / ReLU stay f32 in-kernel.
    x_bf = x_big.astype(jnp.bfloat16)
    params_bf = jax.tree_util.tree_map(lambda p: p.astype(jnp.bfloat16), params)
    out_bf = jax.block_until_ready(fwd(x_bf, params_bf))
    ref_bf = _reference_forward(x_bf, params_bf)
    assert jnp.allclose(out_bf.astype(jnp.float32), ref_bf, atol=1e-1, rtol=1e-1)

    print("KERNEL_OK")
</pallas_src>

<mosaic_0001>
module attributes {stable_mosaic.version = 11 : i64} {
  func.func @_mlp_kernel(%arg0: i32, %arg1: memref<16x16xf32, #tpu.memory_space<vmem>>, %arg2: memref<32x16xf32, #tpu.memory_space<vmem>>, %arg3: memref<32x1xf32, #tpu.memory_space<vmem>>, %arg4: memref<32x32xf32, #tpu.memory_space<vmem>>, %arg5: memref<32x1xf32, #tpu.memory_space<vmem>>, %arg6: memref<8x32xf32, #tpu.memory_space<vmem>>, %arg7: memref<8x1xf32, #tpu.memory_space<vmem>>, %arg8: memref<8x16xf32, #tpu.memory_space<vmem>>) attributes {dimension_semantics = [#tpu.dimension_semantics<parallel>], iteration_bounds = array<i64: 1>, scalar_prefetch = 0 : i64, scratch_operands = 0 : i64, tpu.core_type = #tpu.core_type<tc>, window_params = [{transform_indices = @transform_0, window_bounds = array<i64: 16, 16>}, {pipeline_mode = #tpu.pipeline_mode<synchronous>, transform_indices = @transform_1, window_bounds = array<i64: 32, 16>}, {pipeline_mode = #tpu.pipeline_mode<synchronous>, transform_indices = @transform_2, window_bounds = array<i64: 32, 1>}, {pipeline_mode = #tpu.pipeline_mode<synchronous>, transform_indices = @transform_3, window_bounds = array<i64: 32, 32>}, {pipeline_mode = #tpu.pipeline_mode<synchronous>, transform_indices = @transform_4, window_bounds = array<i64: 32, 1>}, {pipeline_mode = #tpu.pipeline_mode<synchronous>, transform_indices = @transform_5, window_bounds = array<i64: 8, 32>}, {pipeline_mode = #tpu.pipeline_mode<synchronous>, transform_indices = @transform_6, window_bounds = array<i64: 8, 1>}, {transform_indices = @transform_7, window_bounds = array<i64: 8, 16>}]} {
    %c0 = arith.constant 0 : index
    %c0_0 = arith.constant 0 : index
    %0 = vector.load %arg2[%c0, %c0_0] : memref<32x16xf32, #tpu.memory_space<vmem>>, vector<32x16xf32>
    %c0_1 = arith.constant 0 : index
    %c0_2 = arith.constant 0 : index
    %1 = vector.load %arg1[%c0_1, %c0_2] : memref<16x16xf32, #tpu.memory_space<vmem>>, vector<16x16xf32>
    %cst = arith.constant dense<0.000000e+00> : vector<32x16xf32>
    %2 = tpu.matmul %0, %1, %cst {dimension_numbers = #tpu.dot_dimension_numbers<[1], [1], [0], [0], [0, 0, 1, 0], [], []>} : vector<32x16xf32>, vector<16x16xf32>, vector<32x16xf32> -> vector<32x16xf32>
    %c0_3 = arith.constant 0 : index
    %c0_4 = arith.constant 0 : index
    %3 = vector.load %arg3[%c0_3, %c0_4] : memref<32x1xf32, #tpu.memory_space<vmem>>, vector<32x1xf32>
    %4 = vector.broadcast %3 : vector<32x1xf32> to vector<32x16xf32>
    %5 = arith.addf %2, %4 : vector<32x16xf32>
    %cst_5 = arith.constant 0.000000e+00 : f32
    %6 = vector.broadcast %cst_5 : f32 to vector<32x16xf32>
    %7 = arith.maximumf %5, %6 : vector<32x16xf32>
    %c0_6 = arith.constant 0 : index
    %c0_7 = arith.constant 0 : index
    %8 = vector.load %arg4[%c0_6, %c0_7] : memref<32x32xf32, #tpu.memory_space<vmem>>, vector<32x32xf32>
    %cst_8 = arith.constant dense<0.000000e+00> : vector<32x16xf32>
    %9 = tpu.matmul %8, %7, %cst_8 {dimension_numbers = #tpu.dot_dimension_numbers<[1], [0], [0], [1], [0, 0, 1, 1], [], []>} : vector<32x32xf32>, vector<32x16xf32>, vector<32x16xf32> -> vector<32x16xf32>
    %c0_9 = arith.constant 0 : index
    %c0_10 = arith.constant 0 : index
    %10 = vector.load %arg5[%c0_9, %c0_10] : memref<32x1xf32, #tpu.memory_space<vmem>>, vector<32x1xf32>
    %11 = vector.broadcast %10 : vector<32x1xf32> to vector<32x16xf32>
    %12 = arith.addf %9, %11 : vector<32x16xf32>
    %cst_11 = arith.constant 0.000000e+00 : f32
    %13 = vector.broadcast %cst_11 : f32 to vector<32x16xf32>
    %14 = arith.maximumf %12, %13 : vector<32x16xf32>
    %c0_12 = arith.constant 0 : index
    %c0_13 = arith.constant 0 : index
    %15 = vector.load %arg6[%c0_12, %c0_13] : memref<8x32xf32, #tpu.memory_space<vmem>>, vector<8x32xf32>
    %cst_14 = arith.constant dense<0.000000e+00> : vector<8x16xf32>
    %16 = tpu.matmul %15, %14, %cst_14 {dimension_numbers = #tpu.dot_dimension_numbers<[1], [0], [0], [1], [0, 0, 1, 1], [], []>} : vector<8x32xf32>, vector<32x16xf32>, vector<8x16xf32> -> vector<8x16xf32>
    %c0_15 = arith.constant 0 : index
    %c0_16 = arith.constant 0 : index
    %17 = vector.load %arg7[%c0_15, %c0_16] : memref<8x1xf32, #tpu.memory_space<vmem>>, vector<8x1xf32>
    %18 = vector.broadcast %17 : vector<8x1xf32> to vector<8x16xf32>
    %19 = arith.addf %16, %18 : vector<8x16xf32>
    %c0_17 = arith.constant 0 : index
    %c0_18 = arith.constant 0 : index
    %20 = vector.load %arg8[%c0_17, %c0_18] : memref<8x16xf32, #tpu.memory_space<vmem>>, vector<8x16xf32>
    tpu.vector_store %arg8[%c0_17, %c0_18], %19 {strides = array<i32>} : memref<8x16xf32, #tpu.memory_space<vmem>>, vector<8x16xf32>,
    return
  }
  func.func @transform_0(%arg0: i32) -> (i32, i32) {
    %c0_i32 = arith.constant 0 : i32
    %c0_i32_0 = arith.constant 0 : i32
    return %arg0, %c0_i32 : i32, i32
  }
  func.func @transform_1(%arg0: i32) -> (i32, i32) {
    %c0_i32 = arith.constant 0 : i32
    %c0_i32_0 = arith.constant 0 : i32
    %c0_i32_1 = arith.constant 0 : i32
    return %c0_i32, %c0_i32_0 : i32, i32
  }
  func.func @transform_2(%arg0: i32) -> (i32, i32) {
    %c0_i32 = arith.constant 0 : i32
    %c0_i32_0 = arith.constant 0 : i32
    %c0_i32_1 = arith.constant 0 : i32
    return %c0_i32, %c0_i32_0 : i32, i32
  }
  func.func @transform_3(%arg0: i32) -> (i32, i32) {
    %c0_i32 = arith.constant 0 : i32
    %c0_i32_0 = arith.constant 0 : i32
    %c0_i32_1 = arith.constant 0 : i32
    return %c0_i32, %c0_i32_0 : i32, i32
  }
  func.func @transform_4(%arg0: i32) -> (i32, i32) {
    %c0_i32 = arith.constant 0 : i32
    %c0_i32_0 = arith.constant 0 : i32
    %c0_i32_1 = arith.constant 0 : i32
    return %c0_i32, %c0_i32_0 : i32, i32
  }
  func.func @transform_5(%arg0: i32) -> (i32, i32) {
    %c0_i32 = arith.constant 0 : i32
    %c0_i32_0 = arith.constant 0 : i32
    %c0_i32_1 = arith.constant 0 : i32
    return %c0_i32, %c0_i32_0 : i32, i32
  }
  func.func @transform_6(%arg0: i32) -> (i32, i32) {
    %c0_i32 = arith.constant 0 : i32
    %c0_i32_0 = arith.constant 0 : i32
    %c0_i32_1 = arith.constant 0 : i32
    return %c0_i32, %c0_i32_0 : i32, i32
  }
  func.func @transform_7(%arg0: i32) -> (i32, i32) {
    %c0_i32 = arith.constant 0 : i32
    %c0_i32_0 = arith.constant 0 : i32
    return %c0_i32, %arg0 : i32, i32
  }
}

</mosaic_0001>

<bundles_post_ra>
// kernel: particle_predictor_forward.1
= control target key start
LH: loop header
LB: loop body
LE: loop exit
PB: predicated region body
PF: predicated region fallthrough
CT: control target
= control target key end

     0   :  { %vm56_vm0 = vcmask 130048   ;;  %v470_v2 = vmov 0   ;;  %vm192_vm2 = vcmask 261120   ;;  %v471_v39 = vmov 0.0|0.0   ;;  %s589_s0 = inlined_call_operand.vmem [shape: f32[16,16], index: 0, kind: input, shape index: {}]   ;;  %s590_s1 = inlined_call_operand.vmem [shape: f32[32,16], index: 1, kind: input, shape index: {}]   ;;  %s591_s2 = inlined_call_operand.vmem [shape: f32[32,1], index: 2, kind: input, shape index: {}]   ;;  %s592_s4 = inlined_call_operand.vmem [shape: f32[32,1], index: 4, kind: input, shape index: {}]   ;;  %s593_s6 = inlined_call_operand.vmem [shape: f32[8,1], index: 6, kind: input, shape index: {}]   ;;  %s594_s3 = inlined_call_operand.vmem [shape: f32[32,32], index: 3, kind: input, shape index: {}]   ;;  %s595_s5 = inlined_call_operand.vmem [shape: f32[8,32], index: 5, kind: input, shape index: {}]   ;;  %s596_s7 = inlined_call_operand.vmem [shape: f32[8,16], index: 7, kind: output, shape index: {}]  }
   0x1   :  { %v30_v0 = vld [vmem:[%s589_s0] sm:$0xff]  ;;  %v31_v1 = vld [vmem:[%s589_s0 + $0x8] sm:$0xff]  ;;  %vm445_vm1 = vmpackc.low %vm56_vm0, %vm56_vm0  ;;  %468 = vset.pattern.permute.xlu0 %v470_v2  ;;  %469 = vset.pattern.permute.xlu1 %v470_v2  ;;  %vm472_vm3 = vmmov 0   ;;  %v473_v40 = vmov 0.0  }
   0x2   :  { %v444_v3 = vpack.c.bf16 %v31_v1, %v30_v0  ;;  %v26_v4 = vld [vmem:[%s590_s1] sm:$0xff]  ;;  %v34_v6 = vld [vmem:[%s591_s2 + $0x10] sm:$0xff]  ;;  %v33_v7 = vld [vmem:[%s591_s2 + $0x8] sm:$0xff] }
   0x3   :  { %413 = vmatprep.mubr.msk.f32.mxu0 %vm56_vm0, %v26_v4  ;;  %v32_v5 = vld [vmem:[%s591_s2] sm:$0xff]  ;;  %48 = vperm.xlu1 %469, %v34_v6   ;;  %v35_v8 = vld [vmem:[%s591_s2 + $0x18] sm:$0xff]  ;;  %v27_v9 = vld [vmem:[%s590_s1 + $0x8] sm:$0xff] }
   0x4   :  { %446 = vmatprep.subr.msk.bf16.mxu0 %vm445_vm1, %v444_v3  ;;  %38 = vperm.xlu0 %468, %v32_v5   ;;  %v168_v10 = vld [vmem:[%s592_s4] sm:$0xff]  ;;  %v28_v11 = vld [vmem:[%s590_s1 + $0x10] sm:$0xff]  ;;  %v169_v12 = vld [vmem:[%s592_s4 + $0x8] sm:$0xff] }
   0x5   :  { %449 = vmatpush3.bf16.xpose.msk.msra.mxu0 %vm445_vm1, %v444_v3  ;;  %v29_v13 = vld [vmem:[%s590_s1 + $0x18] sm:$0xff]  ;;  %v170_v14 = vld [vmem:[%s592_s4 + $0x10] sm:$0xff]  ;;  %v295_v16 = vld [vmem:[%s593_s6] sm:$0xff] }
   0x6   :  { %v171_v15 = vld [vmem:[%s592_s4 + $0x18] sm:$0xff]  ;;  %v164_v17 = vld [vmem:[%s594_s3] sm:$0xff]  ;;  %v165_v36 = vld [vmem:[%s594_s3 + $0x8] sm:$0xff]  ;;  %458 = vmatprep.subr.bf16.mxu0 %v471_v39 }
   0x7   :  { %53 = vperm.xlu1 %469, %v35_v8   ;;  %427 = vmatprep.mubr.msk.f32.mxu1 %vm192_vm2, %v164_v17  ;;  %v166_v37 = vld [vmem:[%s594_s3 + $0x10] sm:$0xff]  ;;  %v167_v38 = vld [vmem:[%s594_s3 + $0x18] sm:$0xff]  ;;  %v294_v59 = vld [vmem:[%s595_s5] sm:$0xff] }
   0x8   :  { %43 = vperm.xlu0 %468, %v33_v7  }
   0xb   :  { %179 = vperm.xlu1 %469, %v169_v12  }
   0xc   :  { %414 = vmatmul.mubr.msk.f32.vlgmr.msra.gmra.mrb[0].mxu0 %vm56_vm0, %v27_v9  ;;  %174 = vperm.xlu0 %468, %v168_v10  }
   0xd   :  { %416 = vmatprep.mubr.msk.f32.mxu0 %vm56_vm0, %v28_v11 }
   0xf   :  { %189 = vperm.xlu1 %469, %v171_v15  }
  0x10   :  { %417 = vmatmul.mubr.msk.f32.gmra.mrb[2].mxu0 %vm56_vm0, %v29_v13  ;;  %184 = vperm.xlu0 %468, %v170_v14  }
  0x11   :  { %441 = vmatprep.mubr.msk.f32.mxu0 %vm472_vm3, %v473_v40 }
  0x14   :  { %298 = vperm.xlu0 %468, %v295_v16  }
  0x82   :  { %v49_v19 = vpop.permute.xlu1 %48 }
  0x83   :  { %v39_v18 = vpop.permute.xlu0 %38 }
  0x86   :  { %v54_v26 = vpop.permute.xlu1 %53 }
  0x87   :  { %v44_v20 = vpop.permute.xlu0 %43 }
  0x8a   :  { %v180_v41 = vpop.permute.xlu1 %179 }
  0x8b   :  { %v175_v42 = vpop.permute.xlu0 %174 }
  0x8e   :  { %v190_v48 = vpop.permute.xlu1 %189 }
  0x8f   :  { %v185_v51 = vpop.permute.xlu0 %184 }
  0x93   :  { %v299_v60 = vpop.permute.xlu0 %298 }
  0xdf   :  { %v415_v21 = vpop.f32.mrb[0].mxu0 }
  0xe0   :  { %v147_v22 = vadd.f32 %v415_v21, %v44_v20  ;;  %v141_v23 = vpop.f32.mrb[1].mxu0 }
  0xe1   :  { %v142_v24 = vadd.f32 %v141_v23, %v39_v18 }
  0xe2   :  { %v161_v25 = vmax.f32 %v147_v22, 0.0 }
  0xe3   :  { %v160_v27 = vmax.f32 %v142_v24, 0.0  ;;  %v418_v28 = vpop.f32.mrb[2].mxu0 }
  0xe4   :  { %v157_v29 = vadd.f32 %v418_v28, %v54_v26  ;;  %v151_v30 = vpop.f32.mrb[3].mxu0 }
  0xe5   :  { %v152_v31 = vadd.f32 %v151_v30, %v49_v19  ;;  %v450_v32 = vpack.c.bf16 %v161_v25, %v160_v27 }
  0xe6   :  { %v163_v33 = vmax.f32 %v157_v29, 0.0 }
  0xe7   :  { %v162_v34 = vmax.f32 %v152_v31, 0.0  ;;  %451 = vmatprep.subr.bf16.mxu1 %v450_v32 }
  0xe8   :  { %453 = vmatpush3.bf16.msra.mxu1 %v450_v32 }
  0xe9   :  { %v454_v35 = vpack.c.bf16 %v163_v33, %v162_v34 }
  0xeb   :  { %455 = vmatprep.subr.bf16.mxu1 %v454_v35 }
  0xec   :  { %457 = vmatpush3.bf16.msra.mxu1 %v454_v35 }
  0xef   :  { %428 = vmatmul.mubr.msk.f32.vlgmr.msra.gmra.mrb[0].mxu1 %vm192_vm2, %v165_v36 }
  0xf0   :  { %430 = vmatprep.mubr.msk.f32.mxu1 %vm192_vm2, %v166_v37 }
  0xf3   :  { %431 = vmatmul.mubr.msk.f32.gmra.mrb[2].mxu1 %vm192_vm2, %v167_v38 }
 0x1c2   :  { %v429_v43 = vpop.f32.mrb[0].mxu1 }
 0x1c3   :  { %v277_v44 = vadd.f32 %v429_v43, %v180_v41  ;;  %v271_v45 = vpop.f32.mrb[1].mxu1 }
 0x1c4   :  { %v272_v46 = vadd.f32 %v271_v45, %v175_v42 }
 0x1c5   :  { %v291_v47 = vmax.f32 %v277_v44, 0.0 }
 0x1c6   :  { %v290_v49 = vmax.f32 %v272_v46, 0.0  ;;  %v432_v50 = vpop.f32.mrb[2].mxu1 }
 0x1c7   :  { %v287_v52 = vadd.f32 %v432_v50, %v190_v48  ;;  %v281_v53 = vpop.f32.mrb[3].mxu1 }
 0x1c8   :  { %v459_v54 = vpack.c.bf16 %v291_v47, %v290_v49  ;;  %v282_v55 = vadd.f32 %v281_v53, %v185_v51 }
 0x1c9   :  { %v293_v56 = vmax.f32 %v287_v52, 0.0 }
 0x1ca   :  { %v292_v57 = vmax.f32 %v282_v55, 0.0  ;;  %460 = vmatpush3.bf16.msra.mxu0 %v459_v54 }
 0x1cb   :  { %461 = vmatprep.subr.bf16.mxu0 %v471_v39 }
 0x1cc   :  { %v462_v58 = vpack.c.bf16 %v293_v56, %v292_v57 }
 0x1ce   :  { %463 = vmatpush3.bf16.msra.mxu0 %v462_v58 }
 0x1d1   :  { %442 = vmatmul.mubr.msk.f32.vlgmr.msra.gmra.mrb[4].mxu0 %vm192_vm2, %v294_v59 }
 0x2a4   :  { %v370_v61 = vpop.f32.mrb[4].mxu0 }
 0x2a5   :  { %v371_v62 = vadd.f32 %v370_v61, %v299_v60  ;;  %v443_v63 = vpop.f32.mrb[5].mxu0 }
 0x2a7   :  { %374 = vst.msk [vmem:[%s596_s7] sm:$0xff] %vm56_vm0, %v371_v62 }

</bundles_post_ra>
